<compile_context>
chip_gen: v7x
topology: tpu7x:2x2x1
jax: 0.10.0
libtpu: 0.0.40
codegen_flags: <defaults>
</compile_context>

<pallas_src>
import functools

import jax
import jax.numpy as jnp
from jax.experimental import pallas as pl
from jax.experimental.pallas import tpu as pltpu


def _channel_attn_kernel(w1t_ref, w2t_ref, x_ref, o_ref, sum_ref, max_ref, *,
                         inv_hw):
    # w1t_ref: (C, Ch)            VMEM, fc[0] weight transposed
    # w2t_ref: (Ch, C)            VMEM, fc[2] weight transposed
    # x_ref:   (BN, C, HW_TILE)   VMEM input block (lane-dense last dim)
    # o_ref:   (BN, C)            VMEM output block, resident across axis 1
    # sum_ref, max_ref: (BN, C)   f32 VMEM accumulators (persist across grid)
    t = pl.program_id(1)

    @pl.when(t == 0)
    def _init():
        sum_ref[...] = jnp.zeros_like(sum_ref)
        max_ref[...] = jnp.full_like(max_ref, -jnp.inf)

    x = x_ref[...].astype(jnp.float32)                 # (BN, C, HW_TILE)
    sum_ref[...] += jnp.sum(x, axis=-1)                # lane reduction -> (BN, C)
    max_ref[...] = jnp.maximum(max_ref[...], jnp.max(x, axis=-1))

    @pl.when(t == pl.num_programs(1) - 1)
    def _finalize():
        avg = sum_ref[...] * inv_hw                    # (BN, C)
        mx = max_ref[...]                              # (BN, C)
        w1t = w1t_ref[...]                             # (C, Ch)
        w2t = w2t_ref[...]                             # (Ch, C)
        h = (jnp.maximum(jnp.dot(avg, w1t, preferred_element_type=jnp.float32), 0.0)
             + jnp.maximum(jnp.dot(mx, w1t, preferred_element_type=jnp.float32), 0.0))
        # fc(avg)+fc(mx) = (relu(avg@W1t)+relu(mx@W1t)) @ W2t  (W2 distributes)
        logits = jnp.dot(h, w2t, preferred_element_type=jnp.float32)
        o_ref[...] = jax.nn.sigmoid(logits).astype(o_ref.dtype)


def channel_attention(x, w1, w2, *, hw_tile=None, batch_tile=None):
    """x: (N,C,H,W); w1: (C//r, C[,1,1]); w2: (C, C//r[,1,1]) -> (N,C,1,1)."""
    N, C, H, W = x.shape
    w1m = w1.reshape(w1.shape[0], C).astype(jnp.float32)     # (Ch, C)
    Ch = w1m.shape[0]
    w2m = w2.reshape(C, Ch).astype(jnp.float32)              # (C, Ch)
    w1t = w1m.T                                              # (C, Ch)
    w2t = w2m.T                                              # (Ch, C)

    HW = H * W
    x_r = x.reshape(N, C, HW)                                # free reshape

    # Batch tile: largest divisor of N that is <= 8 (amortize per-step overhead).
    if batch_tile is None:
        batch_tile = 1
        for bn in (8, 4, 2, 1):
            if N % bn == 0:
                batch_tile = bn
                break
    BN = batch_tile
    assert N % BN == 0, "batch_tile must divide N"

    # Spatial tile: multiple of 128 dividing HW when possible; keep the
    # (double-buffered) input block modest so it fits v7x's smaller VMEM too.
    if hw_tile is None:
        if HW % 128 == 0:
            hw_tile = 128
            budget = 8 * 1024 * 1024  # bytes per input block
            for cand in (2048, 1024, 512, 256, 128):
                if HW % cand == 0 and BN * C * cand * x.dtype.itemsize <= budget:
                    hw_tile = cand
                    break
        else:
            hw_tile = HW  # full-extent block is always legal
    assert HW % hw_tile == 0, "hw_tile must divide H*W"
    num_hw = HW // hw_tile

    kernel = functools.partial(_channel_attn_kernel, inv_hw=1.0 / HW)

    itemsize = x.dtype.itemsize
    cost = pl.CostEstimate(
        flops=2 * N * C * HW + 2 * N * (2 * C * Ch + Ch * C),
        transcendentals=N * C,
        bytes_accessed=N * C * HW * itemsize + N * C * itemsize
        + (w1t.size + w2t.size) * 4,
    )

    out = pl.pallas_call(
        kernel,
        out_shape=jax.ShapeDtypeStruct((N, C), x.dtype),
        grid=(N // BN, num_hw),
        in_specs=[
            pl.BlockSpec((C, Ch), lambda n, t: (0, 0)),           # fc1 weight
            pl.BlockSpec((Ch, C), lambda n, t: (0, 0)),           # fc2 weight
            pl.BlockSpec((BN, C, hw_tile), lambda n, t: (n, 0, t)),  # input slab
        ],
        out_specs=pl.BlockSpec((BN, C), lambda n, t: (n, 0)),
        scratch_shapes=[
            pltpu.VMEM((BN, C), jnp.float32),   # running sum
            pltpu.VMEM((BN, C), jnp.float32),   # running max
        ],
        compiler_params=pltpu.CompilerParams(
            dimension_semantics=("parallel", "arbitrary"),
        ),
        cost_estimate=cost,
    )(w1t, w2t, x_r)

    return out.reshape(N, C, 1, 1)


def _reference(x, w1, w2):
    N, C, H, W = x.shape
    Ch = w1.shape[0]
    w1m = w1.reshape(Ch, C)
    w2m = w2.reshape(C, Ch)
    avg = jnp.mean(x, axis=(2, 3))                     # (N, C)
    mx = jnp.max(x, axis=(2, 3))                       # (N, C)

    def fc(p):
        return jnp.maximum(p @ w1m.T, 0.0) @ w2m.T

    out = jax.nn.sigmoid(fc(avg) + fc(mx))
    return out[:, :, None, None]


if __name__ == "__main__":
    key = jax.random.PRNGKey(0)
    kx, k1, k2 = jax.random.split(key, 3)

    # channel=32 with reduction=16 -> hidden=2 (channel must be >= reduction).
    N, C, H, W = 2, 32, 16, 16
    reduction = 16
    Ch = C // reduction

    x = jax.random.normal(kx, (N, C, H, W), dtype=jnp.float32)
    # Conv2d(C, C//r, 1, bias=False) and Conv2d(C//r, C, 1, bias=False) weights.
    w1 = jax.random.normal(k1, (Ch, C, 1, 1), dtype=jnp.float32) * 0.1
    w2 = jax.random.normal(k2, (C, Ch, 1, 1), dtype=jnp.float32) * 0.1

    # hw_tile=128 -> 2 reduction steps, exercising the accumulator path.
    out = channel_attention(x, w1, w2, hw_tile=128)
    out = jax.block_until_ready(out)

    ref = _reference(x, w1, w2)
    assert out.shape == (N, C, 1, 1)
    assert jnp.allclose(out, ref, atol=1e-5, rtol=1e-5), "mismatch vs reference"

    print("KERNEL_OK")
</pallas_src>

<mosaic_0001>
module attributes {stable_mosaic.version = 11 : i64} {
  func.func @_channel_attn_kernel(%arg0: i32, %arg1: i32, %arg2: memref<32x2xf32, #tpu.memory_space<vmem>>, %arg3: memref<2x32xf32, #tpu.memory_space<vmem>>, %arg4: memref<2x32x128xf32, #tpu.memory_space<vmem>>, %arg5: memref<2x32xf32, #tpu.memory_space<vmem>>, %arg6: memref<2x32xf32, #tpu.memory_space<vmem>>, %arg7: memref<2x32xf32, #tpu.memory_space<vmem>>) attributes {dimension_semantics = [#tpu.dimension_semantics<parallel>, #tpu.dimension_semantics<arbitrary>], iteration_bounds = array<i64: 1, 2>, scalar_prefetch = 0 : i64, scratch_operands = 2 : i64, tpu.core_type = #tpu.core_type<tc>, window_params = [{pipeline_mode = #tpu.pipeline_mode<synchronous>, transform_indices = @transform_0, window_bounds = array<i64: 32, 2>}, {pipeline_mode = #tpu.pipeline_mode<synchronous>, transform_indices = @transform_1, window_bounds = array<i64: 2, 32>}, {transform_indices = @transform_2, window_bounds = array<i64: 2, 32, 128>}, {transform_indices = @transform_3, window_bounds = array<i64: 2, 32>}]} {
    %c0_i32 = arith.constant 0 : i32
    %0 = arith.cmpi eq, %arg1, %c0_i32 : i32
    %1 = arith.extui %0 : i1 to i32
    %c0_i32_0 = arith.constant 0 : i32
    %2 = arith.cmpi ne, %1, %c0_i32_0 : i32
    scf.if %2 {
      %cst_13 = arith.constant 0.000000e+00 : f32
      %15 = vector.broadcast %cst_13 : f32 to vector<2x32xf32>
      %c0_14 = arith.constant 0 : index
      %c0_15 = arith.constant 0 : index
      %16 = vector.load %arg6[%c0_14, %c0_15] : memref<2x32xf32, #tpu.memory_space<vmem>>, vector<2x32xf32>
      tpu.vector_store %arg6[%c0_14, %c0_15], %15 {strides = array<i32>} : memref<2x32xf32, #tpu.memory_space<vmem>>, vector<2x32xf32>,
      %cst_16 = arith.constant 0xFF800000 : f32
      %17 = vector.broadcast %cst_16 : f32 to vector<2x32xf32>
      %c0_17 = arith.constant 0 : index
      %c0_18 = arith.constant 0 : index
      %18 = vector.load %arg7[%c0_17, %c0_18] : memref<2x32xf32, #tpu.memory_space<vmem>>, vector<2x32xf32>
      tpu.vector_store %arg7[%c0_17, %c0_18], %17 {strides = array<i32>} : memref<2x32xf32, #tpu.memory_space<vmem>>, vector<2x32xf32>,
    } else {
    }
    %c0 = arith.constant 0 : index
    %c0_1 = arith.constant 0 : index
    %c0_2 = arith.constant 0 : index
    %3 = vector.load %arg4[%c0, %c0_1, %c0_2] : memref<2x32x128xf32, #tpu.memory_space<vmem>>, vector<2x32x128xf32>
    %c0_3 = arith.constant 0 : index
    %c0_4 = arith.constant 0 : index
    %4 = vector.load %arg6[%c0_3, %c0_4] : memref<2x32xf32, #tpu.memory_space<vmem>>, vector<2x32xf32>
    %cst = arith.constant dense<0.000000e+00> : vector<2x32xf32>
    %5 = vector.multi_reduction <add>, %3, %cst [2] : vector<2x32x128xf32> to vector<2x32xf32>
    %6 = arith.addf %4, %5 : vector<2x32xf32>
    %c0_5 = arith.constant 0 : index
    %c0_6 = arith.constant 0 : index
    %7 = vector.load %arg6[%c0_5, %c0_6] : memref<2x32xf32, #tpu.memory_space<vmem>>, vector<2x32xf32>
    tpu.vector_store %arg6[%c0_5, %c0_6], %6 {strides = array<i32>} : memref<2x32xf32, #tpu.memory_space<vmem>>, vector<2x32xf32>,
    %c0_7 = arith.constant 0 : index
    %c0_8 = arith.constant 0 : index
    %8 = vector.load %arg7[%c0_7, %c0_8] : memref<2x32xf32, #tpu.memory_space<vmem>>, vector<2x32xf32>
    %cst_9 = arith.constant dense<0xFF800000> : vector<2x32xf32>
    %9 = vector.multi_reduction <maximumf>, %3, %cst_9 [2] : vector<2x32x128xf32> to vector<2x32xf32>
    %10 = arith.maximumf %8, %9 : vector<2x32xf32>
    %c0_10 = arith.constant 0 : index
    %c0_11 = arith.constant 0 : index
    %11 = vector.load %arg7[%c0_10, %c0_11] : memref<2x32xf32, #tpu.memory_space<vmem>>, vector<2x32xf32>
    tpu.vector_store %arg7[%c0_10, %c0_11], %10 {strides = array<i32>} : memref<2x32xf32, #tpu.memory_space<vmem>>, vector<2x32xf32>,
    %c1_i32 = arith.constant 1 : i32
    %12 = arith.cmpi eq, %arg1, %c1_i32 : i32
    %13 = arith.extui %12 : i1 to i32
    %c0_i32_12 = arith.constant 0 : i32
    %14 = arith.cmpi ne, %13, %c0_i32_12 : i32
    scf.if %14 {
      %c0_13 = arith.constant 0 : index
      %c0_14 = arith.constant 0 : index
      %15 = vector.load %arg6[%c0_13, %c0_14] : memref<2x32xf32, #tpu.memory_space<vmem>>, vector<2x32xf32>
      %cst_15 = arith.constant 3.906250e-03 : f32
      %16 = vector.broadcast %cst_15 : f32 to vector<2x32xf32>
      %17 = arith.mulf %15, %16 : vector<2x32xf32>
      %c0_16 = arith.constant 0 : index
      %c0_17 = arith.constant 0 : index
      %18 = vector.load %arg7[%c0_16, %c0_17] : memref<2x32xf32, #tpu.memory_space<vmem>>, vector<2x32xf32>
      %c0_18 = arith.constant 0 : index
      %c0_19 = arith.constant 0 : index
      %19 = vector.load %arg2[%c0_18, %c0_19] : memref<32x2xf32, #tpu.memory_space<vmem>>, vector<32x2xf32>
      %c0_20 = arith.constant 0 : index
      %c0_21 = arith.constant 0 : index
      %20 = vector.load %arg3[%c0_20, %c0_21] : memref<2x32xf32, #tpu.memory_space<vmem>>, vector<2x32xf32>
      %cst_22 = arith.constant dense<0.000000e+00> : vector<2x2xf32>
      %21 = tpu.matmul %17, %19, %cst_22 {dimension_numbers = #tpu.dot_dimension_numbers<[1], [0], [0], [1], [0, 0, 1, 1], [], []>} : vector<2x32xf32>, vector<32x2xf32>, vector<2x2xf32> -> vector<2x2xf32>
      %cst_23 = arith.constant 0.000000e+00 : f32
      %22 = vector.broadcast %cst_23 : f32 to vector<2x2xf32>
      %23 = arith.maximumf %21, %22 : vector<2x2xf32>
      %cst_24 = arith.constant dense<0.000000e+00> : vector<2x2xf32>
      %24 = tpu.matmul %18, %19, %cst_24 {dimension_numbers = #tpu.dot_dimension_numbers<[1], [0], [0], [1], [0, 0, 1, 1], [], []>} : vector<2x32xf32>, vector<32x2xf32>, vector<2x2xf32> -> vector<2x2xf32>
      %cst_25 = arith.constant 0.000000e+00 : f32
      %25 = vector.broadcast %cst_25 : f32 to vector<2x2xf32>
      %26 = arith.maximumf %24, %25 : vector<2x2xf32>
      %27 = arith.addf %23, %26 : vector<2x2xf32>
      %cst_26 = arith.constant dense<0.000000e+00> : vector<2x32xf32>
      %28 = tpu.matmul %27, %20, %cst_26 {dimension_numbers = #tpu.dot_dimension_numbers<[1], [0], [0], [1], [0, 0, 1, 1], [], []>} : vector<2x2xf32>, vector<2x32xf32>, vector<2x32xf32> -> vector<2x32xf32>
      %29 = arith.negf %28 : vector<2x32xf32>
      %30 = math.exp %29 : vector<2x32xf32>
      %cst_27 = arith.constant 1.000000e+00 : f32
      %31 = vector.broadcast %cst_27 : f32 to vector<2x32xf32>
      %32 = arith.addf %31, %30 : vector<2x32xf32>
      %33 = arith.divf %31, %32 : vector<2x32xf32>
      %c0_28 = arith.constant 0 : index
      %c0_29 = arith.constant 0 : index
      %34 = vector.load %arg5[%c0_28, %c0_29] : memref<2x32xf32, #tpu.memory_space<vmem>>, vector<2x32xf32>
      tpu.vector_store %arg5[%c0_28, %c0_29], %33 {strides = array<i32>} : memref<2x32xf32, #tpu.memory_space<vmem>>, vector<2x32xf32>,
    } else {
    }
    return
  }
  func.func @transform_0(%arg0: i32, %arg1: i32) -> (i32, i32) {
    %c0_i32 = arith.constant 0 : i32
    %c0_i32_0 = arith.constant 0 : i32
    %c0_i32_1 = arith.constant 0 : i32
    return %c0_i32, %c0_i32_0 : i32, i32
  }
  func.func @transform_1(%arg0: i32, %arg1: i32) -> (i32, i32) {
    %c0_i32 = arith.constant 0 : i32
    %c0_i32_0 = arith.constant 0 : i32
    %c0_i32_1 = arith.constant 0 : i32
    return %c0_i32, %c0_i32_0 : i32, i32
  }
  func.func @transform_2(%arg0: i32, %arg1: i32) -> (i32, i32, i32) {
    %c0_i32 = arith.constant 0 : i32
    %c0_i32_0 = arith.constant 0 : i32
    return %arg0, %c0_i32, %arg1 : i32, i32, i32
  }
  func.func @transform_3(%arg0: i32, %arg1: i32) -> (i32, i32) {
    %c0_i32 = arith.constant 0 : i32
    %c0_i32_0 = arith.constant 0 : i32
    return %arg0, %c0_i32 : i32, i32
  }
}

</mosaic_0001>

<bundles_post_ra>
// kernel: tpu_custom_call.1
= control target key start
LH: loop header
LB: loop body
LE: loop exit
PB: predicated region body
PF: predicated region fallthrough
CT: control target
= control target key end

     0   :  { %8 = vsyncpa [#allocation5], 0  ;;  %s1150_s0 = inlined_call_operand.vmem [shape: f32[32,2], index: 0, kind: input, shape index: {}]   ;;  %s1151_s1 = inlined_call_operand.vmem [shape: f32[2,32], index: 1, kind: input, shape index: {}]   ;;  %s1152_s2 = inlined_call_operand.hbm [shape: f32[2,32,256], index: 2, kind: input, shape index: {}]   ;;  %s1153_s3 = inlined_call_operand.hbm [shape: f32[2,32], index: 3, kind: output, shape index: {}]  }
   0x1   :  { %10 = vsyncpa [#allocation5 + $0x1], 0 }
   0x2   :  { %11 = vsyncpa [#allocation6], 0  ;;  %s962_s12 = smov 0   ;;  %s964_s13 = smov 0  }
   0x3   :  { %s966_s14 = smov 0   ;;  %s968_s15 = smov 0  }
   0x4   :  { %s970_s16 = smov 0   ;;  %s972_s17 = smov 0  }
   0x5 LB: > { %s677_s18 = sadd.s32 4294967295, %s930_s17   ;;  %s26_s19 = sadd.s32 1, %s926_s16  ;;  %s930_s17 = sphi %s972_s17, %s17_s17   ;;  %s926_s16 = sphi %s970_s16, %s1163_s16   ;;  %s922_s15 = sphi %s968_s15, %s1162_s15   ;;  %s918_s14 = sphi %s966_s14, %s1161_s14   ;;  %s914_s13 = sphi %s964_s13, %s1160_s13   ;;  %s910_s12 = sphi %s962_s12, %s1159_s12  }
   0x6   : > { %p27_p0 = scmp.ge.s32.totalorder %s26_s19, 2  ;;  %s80_s20 = sadd.s32 1, %s918_s14 }
   0x7   : > { %p87_p1 = scmp.ne.s32.totalorder %s918_s14, %s914_s13  ;;  %p88_p2 = scmp.eq.s32.totalorder %s930_s17, 0 }
   0x8   : > { %s1165_s19 = smov (%p27_p0, %s26_s19), 0  ;;  %p93_p4 = scmp.ne.s32.totalorder %s914_s13, %s910_s12 }
   0x9   : > { %p998_p3 = por %p88_p2, %p87_p1  ;;  %s76_s22 = ssub.s32 %s926_s16, %s1165_s19 }
   0xa   : > { %p94_p5 = scmp.eq.s32.totalorder %s677_s18, 0  ;;  %p78_p6 = scmp.eq.s32.totalorder %s76_s22, 0 }
   0xb   : > { %p756_p8 = scmp.lt.s32.totalorder %s930_s17, 2  ;;  %s149_s25 = sand.u32 1, %s918_s14  }
   0xc   : > { %p1007_p7 = por %p94_p5, %p93_p4  ;;  %s681_s26 = sshll.u32 %s926_s16, 7 }
   0xd   : > { %s1013_s24 = scalar_select %p78_p6, %s918_s14, %s80_s20  }
   0xe   : > { %s680_s27 = sshll.u32 %s149_s25, 6  ;;  %s1020_s30 = scalar_lea.hbm %s1152_s2, %s681_s26 }
   0xf   : > { %s153_s4 = scalar_lea.vmem [#allocation4], %s680_s27  ;;  %p1024_p9 = pnand %p756_p8, %p998_p3 }
  0x10   : > { %s162_s5 = sshll.u32 %s153_s4, 4  ;;  %s1031_s7 = scalar_lea.sflag [#allocation5], %s149_s25  ;;  %s1028_s5 = int_to_ptr.vmem [resolvable:$true] %s162_s5 }
  0x11   : > { %s820_s8 = scalar_lea.hbm %s1020_s30, 1024  ;;  %p822_p12 = pneg %p1024_p9 }
  0x12   : > { %p821_p11 = scmp.ne.s32.totalorder %s1020_s30, %s820_s8  ;;  %s825_s11 = scalar_lea.hbm %s1152_s2, 2048 }
  0x13   : > { %p826_p1 = scmp.lt.u32.totalorder %s1020_s30, %s1152_s2  ;;  %p827_p2 = scmp.lt.u32.totalorder %s825_s11, %s820_s8 }
  0x14   : > { %p823_p13 = pnand %p822_p12, %p821_p11  ;;  %p829_p4 = scmp.lt.u32.totalorder %s820_s8, %s1020_s30 }
  0x15   : > { %p828_p3 = por %p827_p2, %p826_p1 }
  0x16   : > { %p824_p0 = pneg %p823_p13 }
  0x17   : > { %p830_p5 = por %p829_p4, %p828_p3 }
  0x19   : > { %p831_p6 = pnand %p830_p5, %p824_p0 }
  0x1b   : > { %834 = shalt.err (!%p831_p6)
}
  0x1c   : > { %s835_s21 = scalar_lea.vmem %s1028_s5, 1024  ;;  %s932_s22 = smov [#allocation4]  }
  0x1d   : > { %p836_p8 = scmp.ne.s32.totalorder %s1028_s5, %s835_s21  ;;  %s840_s25 = sshll.u32 %s932_s22, 4  ;;  %s841_s25 = int_to_ptr.vmem [resolvable:$false] %s840_s25 }
  0x1e   : > { %s842_s26 = scalar_lea.vmem %s841_s25, 2048  ;;  %p843_p10 = scmp.lt.s32.totalorder %s1028_s5, %s841_s25 }
  0x1f   : > { %p838_p11 = pnand %p836_p8, %p822_p12  ;;  %p844_p1 = scmp.lt.s32.totalorder %s842_s26, %s835_s21 }
  0x21   : > { %p839_p13 = pneg %p838_p11  ;;  %p845_p2 = por %p844_p1, %p843_p10 }
  0x23   : > { %p846_p3 = pnand %p845_p2, %p839_p13 }
  0x25   : > { %849 = shalt.err (!%p846_p3)
}
  0x26   : > { %s933_s27 = smov 256   ;;  %s934_s28 = smov 128  }
  0x27   : > { %s935_s29 = smov 8   ;;  %p170_p12 = scmp.lt.s32.totalorder %s930_s17, 3 }
  0x28   : > { %755 = dma.hbm_to_vmem [thread:$0]  (!%p1024_p9), %s1020_s30, 1024, %s1028_s5, %s1031_s7, %s933_s27, %s934_s28, %s935_s29  }
  0x29   : > { %p1157_p0 = scmp.ge.s32.totalorder %s930_s17, 1 }
  0x2b   : > { %p171_p4 = pnand %p1157_p0, %p170_p12 }
  0x2c   : > { %s176_s4 = sand.u32 (!%p171_p4), 1, %s914_s13  }
  0x2d   : > { %174 = sbr.rel (%p171_p4) target bundleno = 728 (0x2d8), region = 32  ;;  %s683_s8 = sshll.u32 (!%p171_p4), %s176_s4, 6 }
  0x2e   : > { %s177_s9 = scalar_lea.sflag (!%p171_p4), [#allocation5], %s176_s4  ;;  %s180_s10 = scalar_lea.vmem (!%p171_p4), [#allocation4], %s683_s8 }
  0x34   : > { %901 = dma.done.wait (%p1007_p7), %s177_s9, 1024  }
  0x35   : > { %903 = vsyncadd (%p1007_p7), %s177_s9, 4294966272  ;;  %p684_p10 = scmp.ne.s32.totalorder %s922_s15, 0 }
  0x36   : > { %vm203_vm0 = vcmask (!%p684_p10), 254976   ;;  %v936_v0 = vmov (!%p684_p10), 0.0   ;;  %v937_v1 = vmov (!%p684_p10), -inf  }
  0x37   : > { %202 = sbr.rel (%p684_p10) target bundleno = 62 (0x3e), region = 40  ;;  %204 = vst.msk [vmem:[#allocation2] sm:$0x3] (!%p684_p10), %vm203_vm0, %v936_v0  ;;  %205 = vst.msk [vmem:[#allocation3] sm:$0x3] (!%p684_p10), %vm203_vm0, %v937_v1 }
  0x3e PF: > { %v210_v2 = vld [vmem:[%s180_s10 + $0x20] sm:$0xff]  ;;  %v211_v4 = vld [vmem:[%s180_s10 + $0x28] sm:$0xff]  ;;  %v212_v6 = vld [vmem:[%s180_s10 + $0x30] sm:$0xff]  ;;  %v239_v14 = vlaneseq  ;;  %vm250_vm1 = vcmask 130112   ;;  %vm257_vm2 = vcmask 195712   ;;  %vm264_vm3 = vcmask 261312  }
  0x3f   : > { %v206_v3 = vld [vmem:[%s180_s10] sm:$0xff]  ;;  %223 = vadd.xlane.f32.xlu1 %v210_v2  ;;  %v207_v5 = vld [vmem:[%s180_s10 + $0x8] sm:$0xff]  ;;  %v208_v7 = vld [vmem:[%s180_s10 + $0x10] sm:$0xff]  ;;  %vm285_vm4 = vcmask 1041409   ;;  %vm289_vm5 = vcmask 254976   ;;  %p685_p7 = scmp.ne.s32.totalorder %s922_s15, 1 }
  0x40   : > { %215 = vadd.xlane.f32.xlu0 %v206_v3  ;;  %v213_v8 = vld [vmem:[%s180_s10 + $0x38] sm:$0xff]  ;;  %v240_v17 = vand.u32 127, %v239_v14  ;;  %v242_v21 = vshrl.u32 %v239_v14, 7  ;;  %vm939_vm6 = vmmov (!%p685_p7), 0   ;;  %vm370_vm7 = vcmask (!%p685_p7), 261120  }
  0x41   : > { %v209_v9 = vld [vmem:[%s180_s10 + $0x18] sm:$0xff]  ;;  %vm524_vm8 = vcmask (!%p685_p7), 1041408   ;;  %vm520_vm9 = vcmask (!%p685_p7), 15360  }
  0x42   : > { %v245_v18 = vadd.s32 4294967288, %v240_v17  ;;  %v252_v22 = vadd.s32 4294967280, %v240_v17  ;;  %v259_v26 = vadd.s32 4294967272, %v240_v17  ;;  %v243_v27 = vsub.s32 %v240_v17, %v242_v21  ;;  %v214_v52 = vld [vmem:[#allocation2] sm:$0x3] }
  0x43   : > { %225 = vadd.xlane.f32.xlu1 %v211_v4  ;;  %v291_v1 = vld [vmem:[#allocation3] sm:$0x3]  ;;  %v369_v17 = vld [vmem:[%s1151_s1] sm:$0x3] (!%p685_p7) }
  0x44   : > { %217 = vadd.xlane.f32.xlu0 %v207_v5  ;;  %v248_v23 = vsub.s32 %v245_v18, %v242_v21  ;;  %v255_v28 = vsub.s32 %v252_v22, %v242_v21  ;;  %v262_v33 = vsub.s32 %v259_v26, %v242_v21 }
  0x47   : > { %294 = vmax.xlane.f32.xlu1 %v207_v5 }
  0x48   : > { %292 = vmax.xlane.f32.xlu0 %v206_v3 }
  0x4b   : > { %302 = vmax.xlane.f32.xlu1 %v211_v4 }
  0x4c   : > { %300 = vmax.xlane.f32.xlu0 %v210_v2 }
  0x4f   : > { %227 = vadd.xlane.f32.xlu1 %v212_v6 }
  0x50   : > { %219 = vadd.xlane.f32.xlu0 %v208_v7 }
  0x53   : > { %304 = vmax.xlane.f32.xlu1 %v212_v6  ;;  %v365_v6 = vld [vmem:[%s1150_s0] sm:$0xff] (!%p685_p7) }
  0x54   : > { %296 = vmax.xlane.f32.xlu0 %v208_v7  ;;  %v366_v7 = vld [vmem:[%s1150_s0 + $0x8] sm:$0xff] (!%p685_p7) }
  0x57   : > { %229 = vadd.xlane.f32.xlu1 %v213_v8 }
  0x58   : > { %221 = vadd.xlane.f32.xlu0 %v209_v9 }
  0x5b   : > { %306 = vmax.xlane.f32.xlu1 %v213_v8  ;;  %v367_v8 = vld [vmem:[%s1150_s0 + $0x10] sm:$0xff] (!%p685_p7) }
  0x5c   : > { %298 = vmax.xlane.f32.xlu0 %v209_v9  ;;  %v938_v9 = vmov (!%p685_p7), 0.0|0.0  }
  0x5d   : > { %734 = vmatprep.subr.bf16.mxu0 (!%p685_p7), %v938_v9  ;;  %740 = vmatprep.subr.bf16.mxu1 (!%p685_p7), %v938_v9 }
  0xcc   : > { %v224_v10 = vpop.xlane.xlu1 %223 }
  0xcd   : > { %v216_v11 = vpop.xlane.xlu0 %215  ;;  %v269_v34 = vrot.slane %v224_v10, %v243_v27  ;;  %v735_v10 = vpack.c.bf16 (!%p685_p7), %v366_v7, %v365_v6 }
  0xce   : > { %v244_v35 = vrot.slane %v216_v11, %v243_v27  ;;  %v368_v11 = vld [vmem:[%s1150_s0 + $0x18] sm:$0xff] (!%p685_p7) }
  0xcf   : > { %736 = vmatpush3.bf16.msra.mxu0 (!%p685_p7), %v735_v10  ;;  %742 = vmatpush3.bf16.msra.mxu1 (!%p685_p7), %v735_v10 }
  0xd0   : > { %v226_v12 = vpop.xlane.xlu1 %225  ;;  %737 = vmatprep.subr.bf16.mxu0 (!%p685_p7), %v938_v9  ;;  %743 = vmatprep.subr.bf16.mxu1 (!%p685_p7), %v938_v9 }
  0xd1   : > { %v218_v13 = vpop.xlane.xlu0 %217  ;;  %v273_v29 = vrot.slane %v226_v12, %v248_v23  ;;  %v940_v12 = vmov (!%p685_p7), 0.0  }
  0xd2   : > { %v249_v30 = vrot.slane %v218_v13, %v248_v23  ;;  %715 = vmatprep.mubr.msk.f32.mxu0 (!%p685_p7), %vm939_vm6, %v940_v12  ;;  %726 = vmatprep.mubr.msk.f32.mxu1 (!%p685_p7), %vm939_vm6, %v940_v12  ;;  %v738_v13 = vpack.c.bf16 (!%p685_p7), %v368_v11, %v367_v8 }
  0xd3   : > { %v274_v38 = vsel %vm250_vm1, %v273_v29, %v269_v34 }
  0xd4   : > { %v295_v15 = vpop.xlane.xlu1 %294  ;;  %v251_v39 = vsel %vm250_vm1, %v249_v30, %v244_v35  ;;  %739 = vmatpush3.bf16.msra.mxu0 (!%p685_p7), %v738_v13  ;;  %745 = vmatpush3.bf16.msra.mxu1 (!%p685_p7), %v738_v13 }
  0xd5   : > { %v293_v16 = vpop.xlane.xlu0 %292  ;;  %v323_v40 = vrot.slane %v295_v15, %v248_v23  ;;  %729 = vmatprep.subr.mxu0 (!%p685_p7), %v940_v12 }
  0xd6   : > { %v319_v41 = vrot.slane %v293_v16, %v243_v27 }
  0xd8   : > { %v303_v19 = vpop.xlane.xlu1 %302  ;;  %v324_v55 = vsel %vm250_vm1, %v323_v40, %v319_v41 }
  0xd9   : > { %v301_v20 = vpop.xlane.xlu0 %300  ;;  %v342_v44 = vrot.slane %v303_v19, %v248_v23 }
  0xda   : > { %v338_v45 = vrot.slane %v301_v20, %v243_v27 }
  0xdc   : > { %v228_v24 = vpop.xlane.xlu1 %227  ;;  %v343_v59 = vsel %vm250_vm1, %v342_v44, %v338_v45 }
  0xdd   : > { %v220_v25 = vpop.xlane.xlu0 %219  ;;  %v278_v36 = vrot.slane %v228_v24, %v255_v28 }
  0xde   : > { %v256_v37 = vrot.slane %v220_v25, %v255_v28 }
  0xdf   : > { %v279_v48 = vsel %vm257_vm2, %v278_v36, %v274_v38 }
  0xe0   : > { %v305_v31 = vpop.xlane.xlu1 %304  ;;  %v258_v49 = vsel %vm257_vm2, %v256_v37, %v251_v39 }
  0xe1   : > { %v297_v32 = vpop.xlane.xlu0 %296  ;;  %v347_v50 = vrot.slane %v305_v31, %v255_v28 }
  0xe2   : > { %v328_v51 = vrot.slane %v297_v32, %v255_v28 }
  0xe3   : > { %v348_v63 = vsel %vm257_vm2, %v347_v50, %v343_v59 }
  0xe4   : > { %v230_v42 = vpop.xlane.xlu1 %229  ;;  %v329_v0 = vsel %vm257_vm2, %v328_v51, %v324_v55 }
  0xe5   : > { %v222_v43 = vpop.xlane.xlu0 %221  ;;  %v283_v46 = vrot.slane %v230_v42, %v262_v33 }
  0xe6   : > { %v263_v47 = vrot.slane %v222_v43, %v262_v33 }
  0xe7   : > { %v284_v53 = vsel %vm264_vm3, %v283_v46, %v279_v48 }
  0xe8   : > { %v265_v54 = vsel %vm264_vm3, %v263_v47, %v258_v49  ;;  %v307_v57 = vpop.xlane.xlu1 %306 }
  0xe9   : > { %v286_v56 = vsel %vm285_vm4, %v284_v53, %v265_v54  ;;  %v299_v58 = vpop.xlane.xlu0 %298  ;;  %v352_v61 = vrot.slane %v307_v57, %v262_v33 }
  0xea   : > { %v288_v60 = vadd.f32 %v286_v56, %v214_v52  ;;  %v333_v62 = vrot.slane %v299_v58, %v262_v33  ;;  %361 = sbr.rel (%p685_p7) target bundleno = 703 (0x2bf), region = 44 }
  0xeb   : > { %v353_v2 = vsel %vm264_vm3, %v352_v61, %v348_v63 }
  0xec   : > { %290 = vst.msk [vmem:[#allocation2] sm:$0x3] %vm289_vm5, %v288_v60  ;;  %v334_v3 = vsel %vm264_vm3, %v333_v62, %v329_v0 }
  0xed   : > { %v354_v4 = vsel %vm285_vm4, %v353_v2, %v334_v3 }
  0xee   : > { %v356_v5 = vmax.f32 %v291_v1, %v354_v4 }
  0xf0   : > { %357 = vst.msk [vmem:[#allocation3] sm:$0x3] %vm289_vm5, %v356_v5 }
  0xf3   : > { %v362_v14 = vld [vmem:[#allocation2] sm:$0x3] }
  0xf4   : > { %v363_v15 = vmul.f32 0.00390625, %v362_v14 }
  0xf6   : > { %716 = vmatmul.mubr.msk.f32.vlgmr.msra.gmra.mrb[0].mxu0 %vm370_vm7, %v363_v15 }
  0xf7   : > { %v364_v16 = vld [vmem:[#allocation3] sm:$0x3]  ;;  %731 = vmatprep.mubr.msk.f32.mxu0 %vm939_vm6, %v940_v12  ;;  %730 = vmatpush3.msk.msra.mxu0 %vm524_vm8, %v369_v17 }
  0xf8   : > { %727 = vmatmul.mubr.msk.f32.vlgmr.msra.gmra.mrb[0].mxu1 %vm370_vm7, %v364_v16 }
 0x1c9   : > { %v440_v18 = vpop.f32.mrb[0].mxu0 }
 0x1ca   : > { %v444_v20 = vmax.f32 %v440_v18, 0.0  ;;  %v717_v22 = vpop.f32.mrb[1].mxu0 }
 0x1cb   : > { %v514_v19 = vpop.f32.mrb[0].mxu1 }
 0x1cc   : > { %v518_v21 = vmax.f32 %v514_v19, 0.0  ;;  %v728_v23 = vpop.f32.mrb[1].mxu1 }
 0x1ce   : > { %v519_v24 = vadd.f32 %v518_v21, %v444_v20 }
 0x1d0   : > { %732 = vmatmul.mubr.msk.f32.vlgmr.msra.gmra.mrb[2].mxu0 %vm520_vm9, %v519_v24 }
 0x2a3   : > { %v594_v25 = vpop.f32.mrb[2].mxu0 }
 0x2a4   : > { %v690_v26 = vmul.f32 -1.442695, %v594_v25  ;;  %v733_v27 = vpop.f32.mrb[3].mxu0 }
 0x2a6   : > { %816 = vpow2.f32 %v690_v26 }
 0x2b0   : > { %v817_v28 = vpop.eup %816 }
 0x2b1   : > { %v601_v29 = vadd.f32 1.0, %v817_v28 }
 0x2b3   : > { %818 = vrcp.f32 %v601_v29 }
 0x2bd   : > { %v819_v30 = vpop.eup %818 }
 0x2be   : > { %604 = vst.msk [vmem:[#allocation7] sm:$0x3] %vm289_vm5, %v819_v30 }
 0x2bf PF: > { %p1106_p9 = scmp.eq.s32.totalorder %s677_s18, 1  ;;  %s941_s25 = smov [#allocation7]  }
 0x2c0   : > { %s614_s26 = sshll.u32 %s941_s25, 4  ;;  %s615_s26 = int_to_ptr.vmem [resolvable:$true] %s614_s26 }
 0x2c1   : > { %s850_s27 = scalar_lea.vmem %s615_s26, 32  ;;  %p857_p11 = scmp.lt.s32.totalorder %s615_s26, %s615_s26 }
 0x2c2   : > { %p851_p5 = scmp.ne.s32.totalorder %s615_s26, %s850_s27  ;;  %p858_p13 = scmp.lt.s32.totalorder %s850_s27, %s850_s27 }
 0x2c4   : > { %p852_p6 = pnand %p851_p5, %p1106_p9  ;;  %p859_p1 = por %p858_p13, %p857_p11 }
 0x2c6   : > { %p853_p8 = pneg %p852_p6 }
 0x2c8   : > { %p860_p2 = pnand %p859_p1, %p853_p8 }
 0x2ca   : > { %863 = shalt.err (!%p860_p2)
}
 0x2cb   : > { %s864_s18 = scalar_lea.hbm %s1153_s3, 32 }
 0x2cc   : > { %p865_p3 = scmp.ne.s32.totalorder %s1153_s3, %s864_s18  ;;  %p870_p4 = scmp.lt.u32.totalorder %s864_s18, %s1153_s3 }
 0x2ce   : > { %p866_p12 = pnand %p865_p3, %p1106_p9 }
 0x2d0   : > { %p867_p0 = pneg %p866_p12 }
 0x2d2   : > { %p872_p10 = pnand %p870_p4, %p867_p0 }
 0x2d4   : > { %875 = shalt.err (!%p872_p10)
}
 0x2d5   : > { %749 = dma.vmem_to_hbm [thread:$0]  (%p1106_p9), %s615_s26, 32, %s1153_s3, [#allocation6]  }
 0x2d6   : > { %905 = dma.done.wait (%p1106_p9), [#allocation6], 32  }
 0x2d7   : > { %907 = vsyncadd (%p1106_p9), [#allocation6], 4294967264 }
 0x2d8 PF: > { %s17_s17 = sadd.s32 1, %s930_s17   ;;  %s1159_s12 = smov %s914_s13 }
 0x2d9   : > { %p14_p7 = scmp.ge.s32.totalorder %s17_s17, 4   ;;  %s1160_s13 = smov %s918_s14 }
 0x2da   : > { %s1161_s14 = smov %s1013_s24  ;;  %s1162_s15 = smov %s926_s16 }
 0x2db   : > { %s1163_s16 = smov %s1165_s19  ;;  %16 = sbr.rel (!%p14_p7) target bundleno = 5 (0x5), region = 78 }
 0x2e2   :  { %627 = vsyncpa [#allocation5], 1 }
 0x2e3   :  { %629 = vsyncpa [#allocation5 + $0x1], 1 }
 0x2e4   :  { %630 = vsyncpa [#allocation6], 1 }
 0x2e5   :  { %632 = vsyncpa [#allocation6 + $0x1], 1 }

</bundles_post_ra>
